<compile_context>
chip_gen: v6e
topology: v6e:2x2x1
jax: 0.10.0
libtpu: 0.0.40
codegen_flags: <defaults>
</compile_context>

<pallas_src>
import jax
import jax.numpy as jnp
from jax.experimental import pallas as pl
from jax.experimental.pallas import tpu as pltpu


def _mlp_sng_kernel(x_ref, w1_ref, b1_ref, w2_ref, b2_ref, out_ref):
    # fc1 + LeakyReLU(0.2).  x/w1/b1 are VMEM-resident (constant block index);
    # recomputing this small matmul per res-tile keeps grid axes independent.
    h = jnp.dot(x_ref[...], w1_ref[...], preferred_element_type=jnp.float32)
    h = h + b1_ref[...]
    h = jnp.where(h > 0, h, 0.2 * h)              # f32 on the VPU
    # fc2 + ReLU on the current res_size column tile of w2 (streamed).
    h = h.astype(w2_ref.dtype)                    # bf16 for native MXU rate
    o = jnp.dot(h, w2_ref[...], preferred_element_type=jnp.float32)
    o = jnp.maximum(o + b2_ref[...], 0.0)         # f32 on the VPU
    out_ref[...] = o.astype(out_ref.dtype)


def mlp_sng(noise, att, params, *, block_b=None, block_n=None,
            compute_dtype=jnp.bfloat16):
    """Pallas forward for MLP_SNG.

    noise: [B, nz] f32, att: [B, attSize] f32.
    params: w1 [nz+attSize, ngh], b1 [ngh], w2 [ngh, resSize], b2 [resSize]
            (weights already transposed to [in, out]; cat order = (noise, att)).
    returns [B, resSize] in noise.dtype.
    """
    B, nz = noise.shape
    _, att_size = att.shape
    K = nz + att_size

    # Concat once in the wrapper; cast matmul operands to bf16.
    x = jnp.concatenate([noise, att], axis=1).astype(compute_dtype)
    w1 = params["w1"].astype(compute_dtype)                    # [K, ngh]
    w2 = params["w2"].astype(compute_dtype)                    # [ngh, res]
    b1 = params["b1"].reshape(1, -1).astype(jnp.float32)       # [1, ngh]
    b2 = params["b2"].reshape(1, -1).astype(jnp.float32)       # [1, res]
    ngh = w1.shape[1]
    res = w2.shape[1]
    out_dtype = noise.dtype

    # Tile sizes: full dims when small, otherwise MXU/lane-friendly tiles.
    if block_b is None:
        block_b = B if B <= 256 else 256          # rows per MXU pass
    if block_n is None:
        block_n = res if res <= 512 else 512      # streamed w2 column tile
    block_b = min(block_b, B)
    block_n = min(block_n, res)

    grid = (pl.cdiv(B, block_b), pl.cdiv(res, block_n))

    in_specs = [
        pl.BlockSpec((block_b, K), lambda i, j: (i, 0)),     # x   (resident per i)
        pl.BlockSpec((K, ngh), lambda i, j: (0, 0)),         # w1  (resident)
        pl.BlockSpec((1, ngh), lambda i, j: (0, 0)),         # b1  (resident)
        pl.BlockSpec((ngh, block_n), lambda i, j: (0, j)),   # w2  (streams over j)
        pl.BlockSpec((1, block_n), lambda i, j: (0, j)),     # b2  (streams over j)
    ]
    out_spec = pl.BlockSpec((block_b, block_n), lambda i, j: (i, j))

    # VMEM budget: ~2x (double-buffered) block bytes + headroom, clamped so the
    # request also fits v7x's 64 MiB physical VMEM.
    itm = jnp.dtype(compute_dtype).itemsize
    block_bytes = (block_b * K * itm + K * ngh * itm + ngh * 4
                   + ngh * block_n * itm + block_n * 4
                   + block_b * block_n * 4)
    vmem_limit = int(min(max(2 * block_bytes + (8 << 20), 32 << 20), 56 << 20))

    n_tiles = grid[1]
    cost = pl.CostEstimate(
        flops=2 * B * K * ngh * n_tiles + 2 * B * ngh * res,
        transcendentals=0,
        bytes_accessed=(x.size * itm + w1.size * itm + w2.size * itm
                        + b1.size * 4 + b2.size * 4 + B * res * 4),
    )

    return pl.pallas_call(
        _mlp_sng_kernel,
        out_shape=jax.ShapeDtypeStruct((B, res), out_dtype),
        grid=grid,
        in_specs=in_specs,
        out_specs=out_spec,
        compiler_params=pltpu.CompilerParams(
            dimension_semantics=("parallel", "parallel"),
            vmem_limit_bytes=vmem_limit,
        ),
        cost_estimate=cost,
    )(x, w1, b1, w2, b2)


def init_params(key, att_size, nz, ngh, res_size):
    """weights_init: W ~ N(0, 0.02), b = 0; stored transposed to [in, out]."""
    k1, k2 = jax.random.split(key)
    w1 = 0.02 * jax.random.normal(k1, (nz + att_size, ngh), jnp.float32)
    w2 = 0.02 * jax.random.normal(k2, (ngh, res_size), jnp.float32)
    return {
        "w1": w1, "b1": jnp.zeros((ngh,), jnp.float32),
        "w2": w2, "b2": jnp.zeros((res_size,), jnp.float32),
    }


def _reference(noise, att, params, dtype=jnp.float32):
    x = jnp.concatenate([noise, att], axis=1).astype(dtype)
    h = jnp.dot(x, params["w1"].astype(dtype),
                preferred_element_type=jnp.float32) + params["b1"]
    h = jnp.where(h > 0, h, 0.2 * h)
    h = jnp.dot(h.astype(dtype), params["w2"].astype(dtype),
                preferred_element_type=jnp.float32) + params["b2"]
    return jnp.maximum(h, 0.0)


if __name__ == "__main__":
    # Small shapes consistent with opt.nz / opt.attSize / opt.ngh / opt.resSize.
    B, nz, att_size, ngh, res_size = 64, 16, 32, 256, 1024

    key = jax.random.PRNGKey(0)
    k_noise, k_att, k_params = jax.random.split(key, 3)

    noise = jax.random.normal(k_noise, (B, nz), jnp.float32)
    att = jax.random.normal(k_att, (B, att_size), jnp.float32)
    params = init_params(k_params, att_size, nz, ngh, res_size)

    out = jax.block_until_ready(mlp_sng(noise, att, params))
    assert out.shape == (B, res_size)

    # Tight check vs a bf16-matched reference, loose check vs the f32 reference.
    ref_bf16 = _reference(noise, att, params, dtype=jnp.bfloat16)
    ref_f32 = _reference(noise, att, params, dtype=jnp.float32)
    assert jnp.allclose(out, ref_bf16, atol=2e-3, rtol=1e-2), "mismatch vs bf16 ref"
    assert jnp.allclose(out, ref_f32, atol=1e-2, rtol=1e-1), "mismatch vs f32 ref"

    print("KERNEL_OK")
</pallas_src>

<mosaic_0001>
module attributes {stable_mosaic.version = 11 : i64} {
  func.func @_mlp_sng_kernel(%arg0: i32, %arg1: i32, %arg2: memref<64x48xbf16, #tpu.memory_space<vmem>>, %arg3: memref<48x256xbf16, #tpu.memory_space<vmem>>, %arg4: memref<1x256xf32, #tpu.memory_space<vmem>>, %arg5: memref<256x512xbf16, #tpu.memory_space<vmem>>, %arg6: memref<1x512xf32, #tpu.memory_space<vmem>>, %arg7: memref<64x512xf32, #tpu.memory_space<vmem>>) attributes {dimension_semantics = [#tpu.dimension_semantics<parallel>, #tpu.dimension_semantics<parallel>], iteration_bounds = array<i64: 1, 2>, scalar_prefetch = 0 : i64, scratch_operands = 0 : i64, tpu.core_type = #tpu.core_type<tc>, window_params = [{transform_indices = @transform_0, window_bounds = array<i64: 64, 48>}, {pipeline_mode = #tpu.pipeline_mode<synchronous>, transform_indices = @transform_1, window_bounds = array<i64: 48, 256>}, {pipeline_mode = #tpu.pipeline_mode<synchronous>, transform_indices = @transform_2, window_bounds = array<i64: 1, 256>}, {transform_indices = @transform_3, window_bounds = array<i64: 256, 512>}, {transform_indices = @transform_4, window_bounds = array<i64: 1, 512>}, {transform_indices = @transform_5, window_bounds = array<i64: 64, 512>}]} {
    %c0 = arith.constant 0 : index
    %c0_0 = arith.constant 0 : index
    %0 = vector.load %arg2[%c0, %c0_0] : memref<64x48xbf16, #tpu.memory_space<vmem>>, vector<64x48xbf16>
    %c0_1 = arith.constant 0 : index
    %c0_2 = arith.constant 0 : index
    %1 = vector.load %arg3[%c0_1, %c0_2] : memref<48x256xbf16, #tpu.memory_space<vmem>>, vector<48x256xbf16>
    %cst = arith.constant dense<0.000000e+00> : vector<64x256xf32>
    %2 = tpu.matmul %0, %1, %cst {dimension_numbers = #tpu.dot_dimension_numbers<[1], [0], [0], [1], [0, 0, 1, 1], [], []>} : vector<64x48xbf16>, vector<48x256xbf16>, vector<64x256xf32> -> vector<64x256xf32>
    %c0_3 = arith.constant 0 : index
    %c0_4 = arith.constant 0 : index
    %3 = vector.load %arg4[%c0_3, %c0_4] : memref<1x256xf32, #tpu.memory_space<vmem>>, vector<1x256xf32>
    %4 = vector.broadcast %3 : vector<1x256xf32> to vector<64x256xf32>
    %5 = arith.addf %2, %4 : vector<64x256xf32>
    %cst_5 = arith.constant 0.000000e+00 : f32
    %6 = vector.broadcast %cst_5 : f32 to vector<64x256xf32>
    %7 = arith.cmpf ogt, %5, %6 : vector<64x256xf32>
    %cst_6 = arith.constant 2.000000e-01 : f32
    %8 = vector.broadcast %cst_6 : f32 to vector<64x256xf32>
    %9 = arith.mulf %8, %5 : vector<64x256xf32>
    %10 = arith.select %7, %5, %9 : vector<64x256xi1>, vector<64x256xf32>
    %11 = arith.truncf %10 : vector<64x256xf32> to vector<64x256xbf16>
    %c0_7 = arith.constant 0 : index
    %c0_8 = arith.constant 0 : index
    %12 = vector.load %arg5[%c0_7, %c0_8] : memref<256x512xbf16, #tpu.memory_space<vmem>>, vector<256x512xbf16>
    %cst_9 = arith.constant dense<0.000000e+00> : vector<64x512xf32>
    %13 = tpu.matmul %11, %12, %cst_9 {dimension_numbers = #tpu.dot_dimension_numbers<[1], [0], [0], [1], [0, 0, 1, 1], [], []>} : vector<64x256xbf16>, vector<256x512xbf16>, vector<64x512xf32> -> vector<64x512xf32>
    %c0_10 = arith.constant 0 : index
    %c0_11 = arith.constant 0 : index
    %14 = vector.load %arg6[%c0_10, %c0_11] : memref<1x512xf32, #tpu.memory_space<vmem>>, vector<1x512xf32>
    %15 = vector.broadcast %14 : vector<1x512xf32> to vector<64x512xf32>
    %16 = arith.addf %13, %15 : vector<64x512xf32>
    %cst_12 = arith.constant 0.000000e+00 : f32
    %17 = vector.broadcast %cst_12 : f32 to vector<64x512xf32>
    %18 = arith.maximumf %16, %17 : vector<64x512xf32>
    %c0_13 = arith.constant 0 : index
    %c0_14 = arith.constant 0 : index
    %19 = vector.load %arg7[%c0_13, %c0_14] : memref<64x512xf32, #tpu.memory_space<vmem>>, vector<64x512xf32>
    tpu.vector_store %arg7[%c0_13, %c0_14], %18 {strides = array<i32>} : memref<64x512xf32, #tpu.memory_space<vmem>>, vector<64x512xf32>,
    return
  }
  func.func @transform_0(%arg0: i32, %arg1: i32) -> (i32, i32) {
    %c0_i32 = arith.constant 0 : i32
    %c0_i32_0 = arith.constant 0 : i32
    return %arg0, %c0_i32 : i32, i32
  }
  func.func @transform_1(%arg0: i32, %arg1: i32) -> (i32, i32) {
    %c0_i32 = arith.constant 0 : i32
    %c0_i32_0 = arith.constant 0 : i32
    %c0_i32_1 = arith.constant 0 : i32
    return %c0_i32, %c0_i32_0 : i32, i32
  }
  func.func @transform_2(%arg0: i32, %arg1: i32) -> (i32, i32) {
    %c0_i32 = arith.constant 0 : i32
    %c0_i32_0 = arith.constant 0 : i32
    %c0_i32_1 = arith.constant 0 : i32
    return %c0_i32, %c0_i32_0 : i32, i32
  }
  func.func @transform_3(%arg0: i32, %arg1: i32) -> (i32, i32) {
    %c0_i32 = arith.constant 0 : i32
    %c0_i32_0 = arith.constant 0 : i32
    return %c0_i32, %arg1 : i32, i32
  }
  func.func @transform_4(%arg0: i32, %arg1: i32) -> (i32, i32) {
    %c0_i32 = arith.constant 0 : i32
    %c0_i32_0 = arith.constant 0 : i32
    return %c0_i32, %arg1 : i32, i32
  }
  func.func @transform_5(%arg0: i32, %arg1: i32) -> (i32, i32) {
    %c0_i32 = arith.constant 0 : i32
    return %arg0, %arg1 : i32, i32
  }
}

</mosaic_0001>

<bundles_post_ra>
// kernel: tpu_custom_call.1
= control target key start
LH: loop header
LB: loop body
LE: loop exit
PB: predicated region body
PF: predicated region fallthrough
CT: control target
= control target key end

     0   :  { %10 = vsyncpa [#allocation3], 0  ;;  %s2050_s0 = inlined_call_operand.vmem [shape: bf16[64,48], index: 0, kind: input, shape index: {}]   ;;  %s2051_s1 = inlined_call_operand.vmem [shape: bf16[48,256], index: 1, kind: input, shape index: {}]   ;;  %s2052_s2 = inlined_call_operand.vmem [shape: f32[1,256], index: 2, kind: input, shape index: {}]   ;;  %s2053_s3 = inlined_call_operand.hbm [shape: bf16[256,1024], index: 3, kind: input, shape index: {}]   ;;  %s2054_s4 = inlined_call_operand.vmem [shape: f32[1,1024], index: 4, kind: input, shape index: {}]   ;;  %s2055_s5 = inlined_call_operand.hbm [shape: f32[64,1024], index: 5, kind: output, shape index: {}]  }
   0x1   :  { %12 = vsyncpa [#allocation3 + $0x1], 0 }
   0x2   :  { %13 = vsyncpa [#allocation4], 0 }
   0x3   :  { %15 = vsyncpa [#allocation4 + $0x1], 0  ;;  %s1685_s18 = smov 0   ;;  %s1687_s19 = smov 0  }
   0x4   :  { %s1689_s20 = smov 0   ;;  %s1691_s21 = smov 0  }
   0x5   :  { %s1693_s22 = smov 0   ;;  %s1695_s23 = smov 0  }
   0x6 LB: > { %s1261_s24 = sadd.s32 4294967295, %s1644_s23   ;;  %s1262_s25 = sadd.s32 4294967294, %s1644_s23   ;;  %s1644_s23 = sphi %s1695_s23, %s21_s23   ;;  %s1640_s22 = sphi %s1693_s22, %s2066_s22   ;;  %s1636_s21 = sphi %s1691_s21, %s2065_s21   ;;  %s1632_s20 = sphi %s1689_s20, %s2064_s20   ;;  %s1628_s19 = sphi %s1687_s19, %s2063_s19   ;;  %s1624_s18 = sphi %s1685_s18, %s2062_s18  }
   0x7   : > { %s30_s26 = sadd.s32 1, %s1640_s22  ;;  %s108_s27 = sadd.s32 1, %s1632_s20 }
   0x8   : > { %p31_p0 = scmp.ge.s32.totalorder %s30_s26, 2  ;;  %p115_p1 = scmp.ne.s32.totalorder %s1632_s20, %s1628_s19 }
   0x9   : > { %p116_p2 = scmp.eq.s32.totalorder %s1644_s23, 0  ;;  %p121_p3 = scmp.ne.s32.totalorder %s1628_s19, %s1624_s18 }
   0xa   : > { %s2068_s26 = smov (%p31_p0, %s30_s26), 0  ;;  %p122_p5 = scmp.eq.s32.totalorder %s1261_s24, 0 }
   0xb   : > { %p1726_p4 = por %p116_p2, %p115_p1  ;;  %s105_s29 = ssub.s32 %s1640_s22, %s2068_s26 }
   0xc   : > { %p173_p6 = scmp.eq.s32.totalorder %s1261_s24, 1  ;;  %p106_p7 = scmp.eq.s32.totalorder %s105_s29, 0 }
   0xd   : > { %p1732_p8 = por %p122_p5, %p121_p3  ;;  %p179_p10 = scmp.eq.s32.totalorder %s1262_s25, 1 }
   0xe   : > { %p1736_p9 = por %p173_p6, %p115_p1  ;;  %p1370_p13 = scmp.lt.s32.totalorder %s1644_s23, 2 }
   0xf   : > { %s1741_s7 = scalar_select %p106_p7, %s1632_s20, %s108_s27  }
  0x10   : > { %p1743_p11 = por %p179_p10, %p121_p3  ;;  %s214_s9 = sand.u32 1, %s1632_s20  }
  0x11   : > { %s1266_s10 = sshll.u32 %s214_s9, 9  ;;  %s1356_s11 = sshll.u32 %s1640_s22, 8 }
  0x12   : > { %s224_s14 = scalar_lea.hbm %s2053_s3, %s1356_s11  ;;  %s218_s15 = scalar_lea.vmem [#allocation2], %s1266_s10 }
  0x13   : > { %s225_s16 = sshll.u32 %s218_s15, 4  ;;  %p1756_p0 = pnand %p1370_p13, %p1726_p4  ;;  %s226_s16 = int_to_ptr.vmem [resolvable:$true] %s225_s16 }
  0x14   : > { %s215_s24 = scalar_lea.sflag [#allocation3], %s214_s9  ;;  %s1549_s25 = scalar_lea.vmem %s226_s16, 8192 }
  0x15   : > { %p1538_p1 = pneg %p1756_p0  ;;  %p1550_p2 = scmp.ne.s32.totalorder %s226_s16, %s1549_s25 }
  0x16   : > { %s1646_s27 = smov [#allocation2]  }
  0x17   : > { %p1552_p3 = pnand %p1550_p2, %p1538_p1  ;;  %s1554_s29 = sshll.u32 %s1646_s27, 4  ;;  %s1555_s29 = int_to_ptr.vmem [resolvable:$false] %s1554_s29 }
  0x18   : > { %s1556_s11 = scalar_lea.vmem %s1555_s29, 16384  ;;  %p1557_p6 = scmp.lt.s32.totalorder %s226_s16, %s1555_s29 }
  0x19   : > { %p1553_p5 = pneg %p1552_p3  ;;  %p1558_p7 = scmp.lt.s32.totalorder %s1556_s11, %s1549_s25 }
  0x1b   : > { %p1559_p10 = por %p1558_p7, %p1557_p6 }
  0x1d   : > { %p1560_p12 = pnand %p1559_p10, %p1553_p5 }
  0x1f   : > { %1563 = shalt.err (!%p1560_p12)
}
  0x20   : > { %s1647_s28 = smov 512   ;;  %s1648_s9 = smov 256  }
  0x21   : > { %s1649_s10 = smov 16   ;;  %p1269_p4 = scmp.ge.s32.totalorder %s1644_s23, 1 }
  0x22   : > { %1365 = dma.hbm_to_vmem [thread:$0]  (!%p1756_p0), %s224_s14, 8192, %s226_s16, %s215_s24, %s1647_s28, %s1648_s9, %s1649_s10  }
  0x23   : > { %p241_p13 = scmp.lt.s32.totalorder %s1644_s23, 3 }
  0x25   : > { %p242_p1 = pnand %p1269_p4, %p241_p13 }
  0x26   : > { %s1767_s12 = sand.u32 (!%p242_p1), 1, %s1628_s19  }
  0x27   : > { %245 = sbr.rel (%p242_p1) target bundleno = 507 (0x1fb), region = 40  ;;  %s1270_s13 = sshll.u32 (!%p242_p1), %s1767_s12, 9 }
  0x28   : > { %s248_s15 = scalar_lea.sflag (!%p242_p1), [#allocation3], %s1767_s12  ;;  %s1771_s25 = scalar_lea.vmem (!%p242_p1), [#allocation2], %s1270_s13 }
  0x2c   : > { %1615 = dma.done.wait (%p1732_p8), %s248_s15, 8192  }
  0x2d   : > { %1617 = vsyncadd (%p1732_p8), %s248_s15, 4294959104  ;;  %v1650_v0 = vmov 0   ;;  %v1427_v1 = vld [vmem:[%s2051_s1 + $0x24] ss:$8 sps:$4 sm:$0xff]   ;;  %v1429_v2 = vld [vmem:[%s2051_s1 + $0x20] ss:$8 sps:$4 sm:$0xff]  }
  0x2e   : > { %423 = vmatprep.mubr.bf16.mxu0 %v1650_v0  ;;  %401 = vmatprep.subr.bf16.mxu0 %v1427_v1  ;;  %v1430_v3 = vld [vmem:[%s2051_s1 + $0x14] ss:$8 sps:$4 sm:$0xff]   ;;  %v1432_v4 = vld [vmem:[%s2051_s1 + $0x10] ss:$8 sps:$4 sm:$0xff]   ;;  %v1433_v5 = vld [vmem:[%s2051_s1 + $0x4] ss:$8 sps:$4 sm:$0xff]  }
  0x2f   : > { %402 = vmatpush1.bf16.msra.mxu0 %v1429_v2  ;;  %v1435_v6 = vld [vmem:[%s2051_s1] ss:$8 sps:$4 sm:$0xff]   ;;  %v1440_v8 = vld [vmem:[%s1771_s25 + $0xe4] ss:$16 sps:$4 sm:$0xff]   ;;  %v1444_v10 = vld [vmem:[%s1771_s25 + $0xec] ss:$16 sps:$4 sm:$0xff]  }
  0x30   : > { %403 = vmatprep.subr.bf16.mxu0 %v1430_v3  ;;  %v1436_v7 = vld [vmem:[%s2050_s0] sm:$0xff]   ;;  %v1442_v9 = vld [vmem:[%s1771_s25 + $0xe8] ss:$16 sps:$4 sm:$0xff]   ;;  %926 = vmatprep.subr.bf16.mxu1 %v1440_v8  ;;  %vm378_vm0 = vcmask 392192   ;;  %v1450_v13 = vld [vmem:[%s1771_s25 + $0xcc] ss:$16 sps:$4 sm:$0xff]  }
  0x31   : > { %v1445_v11 = vld [vmem:[%s1771_s25 + $0xe0] ss:$16 sps:$4 sm:$0xff]   ;;  %v1446_v12 = vld [vmem:[%s1771_s25 + $0xc4] ss:$16 sps:$4 sm:$0xff]   ;;  %v1448_v16 = vld [vmem:[%s1771_s25 + $0xc8] ss:$16 sps:$4 sm:$0xff]  }
  0x32   : > { %927 = vmatpush1.bf16.msra.mxu1 %v1445_v11  ;;  %v1451_v14 = vld [vmem:[%s1771_s25 + $0xc0] ss:$16 sps:$4 sm:$0xff]   ;;  %v1452_v15 = vld [vmem:[%s1771_s25 + $0xa4] ss:$16 sps:$4 sm:$0xff]   ;;  %v1456_v17 = vld [vmem:[%s1771_s25 + $0xac] ss:$16 sps:$4 sm:$0xff]   ;;  %v318_v11 = vlaneseq }
  0x33   : > { %404 = vmatpush1.bf16.msra.mxu0 %v1432_v4  ;;  %928 = vmatprep.subr.bf16.mxu1 %v1446_v12  ;;  %v1457_v18 = vld [vmem:[%s1771_s25 + $0xa0] ss:$16 sps:$4 sm:$0xff]   ;;  %v1458_v19 = vld [vmem:[%s1771_s25 + $0x84] ss:$16 sps:$4 sm:$0xff]   ;;  %v1437_v20 = vld [vmem:[%s2050_s0 + $0x8] sm:$0xff]   ;;  %s1271_s15 = sshll.u32 %s1767_s12, 8 }
  0x34   : > { %405 = vmatprep.subr.bf16.mxu0 %v1433_v5  ;;  %v1454_v21 = vld [vmem:[%s1771_s25 + $0xa8] ss:$16 sps:$4 sm:$0xff]   ;;  %v1462_v22 = vld [vmem:[%s1771_s25 + $0x8c] ss:$16 sps:$4 sm:$0xff]   ;;  %v1463_v23 = vld [vmem:[%s1771_s25 + $0x80] ss:$16 sps:$4 sm:$0xff]  }
  0x35   : > { %v1464_v24 = vld [vmem:[%s1771_s25 + $0x64] ss:$16 sps:$4 sm:$0xff]   ;;  %v1460_v25 = vld [vmem:[%s1771_s25 + $0x88] ss:$16 sps:$4 sm:$0xff]   ;;  %v1468_v26 = vld [vmem:[%s1771_s25 + $0x6c] ss:$16 sps:$4 sm:$0xff]  }
  0x36   : > { %929 = vmatpush1.bf16.msra.mxu1 %v1451_v14  ;;  %v1469_v27 = vld [vmem:[%s1771_s25 + $0x60] ss:$16 sps:$4 sm:$0xff]   ;;  %v1470_v28 = vld [vmem:[%s1771_s25 + $0x44] ss:$16 sps:$4 sm:$0xff]   ;;  %v1466_v30 = vld [vmem:[%s1771_s25 + $0x68] ss:$16 sps:$4 sm:$0xff]  }
  0x37   : > { %406 = vmatpush1.bf16.msra.mxu0 %v1435_v6  ;;  %930 = vmatprep.subr.bf16.mxu1 %v1452_v15  ;;  %v1438_v29 = vld [vmem:[%s2050_s0 + $0x10] sm:$0xff]   ;;  %v1474_v31 = vld [vmem:[%s1771_s25 + $0x4c] ss:$16 sps:$4 sm:$0xff]   ;;  %v1472_v34 = vld [vmem:[%s1771_s25 + $0x48] ss:$16 sps:$4 sm:$0xff]   ;;  %v1879_v12 = vshrl.u32 %v318_v11, 7 }
  0x38   : > { %999 = vmatprep.subr.bf16.mxu0 %v1444_v10  ;;  %v1475_v32 = vld [vmem:[%s1771_s25 + $0x40] ss:$16 sps:$4 sm:$0xff]   ;;  %v1476_v33 = vld [vmem:[%s1771_s25 + $0x24] ss:$16 sps:$4 sm:$0xff]   ;;  %v1480_v35 = vld [vmem:[%s1771_s25 + $0x2c] ss:$16 sps:$4 sm:$0xff]  }
  0x39   : > { %v1481_v36 = vld [vmem:[%s1771_s25 + $0x20] ss:$16 sps:$4 sm:$0xff]   ;;  %v1482_v37 = vld [vmem:[%s1771_s25 + $0x4] ss:$16 sps:$4 sm:$0xff]   ;;  %v1439_v38 = vld [vmem:[%s2050_s0 + $0x18] sm:$0xff]   ;;  %v320_v14 = vsub.s32 0, %v1879_v12 }
  0x3a   : > { %1283 = vmatmul.mubr.msk.bf16.vlgmr.msra.gmra.mxu0 %vm378_vm0, %v1436_v7  ;;  %931 = vmatpush1.bf16.msra.mxu1 %v1457_v18  ;;  %v1478_v39 = vld [vmem:[%s1771_s25 + $0x28] ss:$16 sps:$4 sm:$0xff]   ;;  %v1486_v40 = vld [vmem:[%s1771_s25 + $0xc] ss:$16 sps:$4 sm:$0xff]   ;;  %v1487_v41 = vld [vmem:[%s1771_s25] ss:$16 sps:$4 sm:$0xff]  }
  0x3b   : > { %433 = vmatprep.mubr.bf16.mxu0 %v1650_v0  ;;  %1000 = vmatpush1.bf16.msra.mxu0 %v1442_v9  ;;  %v1488_v42 = vld [vmem:[%s1771_s25 + $0x1e4] ss:$16 sps:$4 sm:$0xff]   ;;  %v1484_v43 = vld [vmem:[%s1771_s25 + $0x8] ss:$16 sps:$4 sm:$0xff]   ;;  %v1492_v44 = vld [vmem:[%s1771_s25 + $0x1ec] ss:$16 sps:$4 sm:$0xff]  }
  0x3c   : > { %1001 = vmatprep.subr.bf16.mxu0 %v1450_v13  ;;  %932 = vmatprep.subr.bf16.mxu1 %v1458_v19  ;;  %v1493_v45 = vld [vmem:[%s1771_s25 + $0x1e0] ss:$16 sps:$4 sm:$0xff]   ;;  %v1490_v46 = vld [vmem:[%s1771_s25 + $0x1e8] ss:$16 sps:$4 sm:$0xff]   ;;  %v1494_v47 = vld [vmem:[%s1771_s25 + $0x1c4] ss:$16 sps:$4 sm:$0xff]  }
  0x3d   : > { %v1498_v48 = vld [vmem:[%s1771_s25 + $0x1cc] ss:$16 sps:$4 sm:$0xff]   ;;  %v1499_v49 = vld [vmem:[%s1771_s25 + $0x1c0] ss:$16 sps:$4 sm:$0xff]   ;;  %v1500_v50 = vld [vmem:[%s1771_s25 + $0x1a4] ss:$16 sps:$4 sm:$0xff]  }
  0x3e   : > { %933 = vmatpush1.bf16.msra.mxu1 %v1463_v23  ;;  %v1496_v51 = vld [vmem:[%s1771_s25 + $0x1c8] ss:$16 sps:$4 sm:$0xff]   ;;  %v1504_v52 = vld [vmem:[%s1771_s25 + $0x1ac] ss:$16 sps:$4 sm:$0xff]   ;;  %v1505_v53 = vld [vmem:[%s1771_s25 + $0x1a0] ss:$16 sps:$4 sm:$0xff]  }
  0x3f   : > { %1002 = vmatpush1.bf16.msra.mxu0 %v1448_v16  ;;  %934 = vmatprep.subr.bf16.mxu1 %v1464_v24  ;;  %v1506_v54 = vld [vmem:[%s1771_s25 + $0x184] ss:$16 sps:$4 sm:$0xff]   ;;  %v1502_v55 = vld [vmem:[%s1771_s25 + $0x1a8] ss:$16 sps:$4 sm:$0xff]   ;;  %v1510_v56 = vld [vmem:[%s1771_s25 + $0x18c] ss:$16 sps:$4 sm:$0xff]  }
  0x40   : > { %1003 = vmatprep.subr.bf16.mxu0 %v1456_v17  ;;  %v1511_v57 = vld [vmem:[%s1771_s25 + $0x180] ss:$16 sps:$4 sm:$0xff]   ;;  %v1512_v58 = vld [vmem:[%s1771_s25 + $0x164] ss:$16 sps:$4 sm:$0xff]   ;;  %v1508_v59 = vld [vmem:[%s1771_s25 + $0x188] ss:$16 sps:$4 sm:$0xff]  }
  0x41   : > { %v1516_v60 = vld [vmem:[%s1771_s25 + $0x16c] ss:$16 sps:$4 sm:$0xff]   ;;  %v1514_v61 = vld [vmem:[%s1771_s25 + $0x168] ss:$16 sps:$4 sm:$0xff]   ;;  %v1517_v62 = vld [vmem:[%s1771_s25 + $0x160] ss:$16 sps:$4 sm:$0xff]  }
  0x42   : > { %1284 = vmatmul.mubr.msk.bf16.gmra.mxu0 %vm378_vm0, %v1437_v20  ;;  %935 = vmatpush1.bf16.msra.mxu1 %v1469_v27  ;;  %v1518_v63 = vld [vmem:[%s1771_s25 + $0x144] ss:$16 sps:$4 sm:$0xff]   ;;  %v1520_v1 = vld [vmem:[%s1771_s25 + $0x148] ss:$16 sps:$4 sm:$0xff]   ;;  %v1523_v2 = vld [vmem:[%s1771_s25 + $0x140] ss:$16 sps:$4 sm:$0xff]  }
  0x43   : > { %443 = vmatprep.mubr.bf16.mxu0 %v1650_v0  ;;  %1004 = vmatpush1.bf16.msra.mxu0 %v1454_v21  ;;  %v1524_v3 = vld [vmem:[%s1771_s25 + $0x124] ss:$16 sps:$4 sm:$0xff]   ;;  %v1528_v4 = vld [vmem:[%s1771_s25 + $0x12c] ss:$16 sps:$4 sm:$0xff]   ;;  %v1526_v5 = vld [vmem:[%s1771_s25 + $0x128] ss:$16 sps:$4 sm:$0xff]  }
  0x44   : > { %1005 = vmatprep.subr.bf16.mxu0 %v1462_v22  ;;  %936 = vmatprep.subr.bf16.mxu1 %v1470_v28  ;;  %v1529_v6 = vld [vmem:[%s1771_s25 + $0x120] ss:$16 sps:$4 sm:$0xff]   ;;  %v1530_v7 = vld [vmem:[%s1771_s25 + $0x104] ss:$16 sps:$4 sm:$0xff]   ;;  %v1534_v8 = vld [vmem:[%s1771_s25 + $0x10c] ss:$16 sps:$4 sm:$0xff]  }
  0x45   : > { %v1532_v9 = vld [vmem:[%s1771_s25 + $0x108] ss:$16 sps:$4 sm:$0xff]   ;;  %v1535_v10 = vld [vmem:[%s1771_s25 + $0x100] ss:$16 sps:$4 sm:$0xff]   ;;  %v324_v13 = vsub.s32 1, %v1879_v12  ;;  %s1933_s14 = scalar_lea.vmem [#allocation5], %s1271_s15 }
  0x46   : > { %937 = vmatpush1.bf16.msra.mxu1 %v1475_v32  ;;  %v316_v15 = vld [vmem:[%s2052_s2] sm:$0x3]  ;;  %s1357_s16 = sshll.u32 %s1636_s21, 9  ;;  %s1153_s17 = sshll.u32 %s1933_s14, 4  ;;  %s1998_s17 = int_to_ptr.vmem [resolvable:$true] %s1153_s17 }
  0x47   : > { %1006 = vmatpush1.bf16.msra.mxu0 %v1460_v25  ;;  %938 = vmatprep.subr.bf16.mxu1 %v1476_v33  ;;  %v1888_v16 = vrot.slane %v316_v15, %v324_v13  ;;  %v1892_v17 = vrot.slane %v316_v15, %v320_v14  ;;  %s1996_s27 = scalar_lea.hbm %s2055_s5, %s1357_s16  ;;  %s1137_s29 = scalar_lea.sflag [#allocation4], %s1767_s12 }
  0x48   : > { %1007 = vmatprep.subr.bf16.mxu0 %v1468_v26  ;;  %s1564_s30 = scalar_lea.vmem %s1998_s17, 4096  ;;  %s1651_s11 = smov [#allocation5]  }
  0x49   : > { %p1565_p12 = scmp.ne.s32.totalorder %s1998_s17, %s1564_s30  ;;  %s1568_s28 = sshll.u32 %s1651_s11, 4  ;;  %s1569_s28 = int_to_ptr.vmem [resolvable:$false] %s1568_s28 }
  0x4a   : > { %1285 = vmatmul.mubr.msk.bf16.gmra.mxu0 %vm378_vm0, %v1438_v29  ;;  %939 = vmatpush1.bf16.msra.mxu1 %v1481_v36  ;;  %p1571_p3 = scmp.lt.s32.totalorder %s1998_s17, %s1569_s28 }
  0x4b   : > { %453 = vmatprep.mubr.bf16.mxu0 %v1650_v0  ;;  %1008 = vmatpush1.bf16.msra.mxu0 %v1466_v30  ;;  %v1522_v0 = vld [vmem:[%s1771_s25 + $0x14c] ss:$16 sps:$4 sm:$0xff]   ;;  %s1272_s25 = sshll.u32 %s1636_s21, 2  ;;  %p1566_p0 = pnand %p1565_p12, %p1736_p9 }
  0x4c   : > { %1009 = vmatprep.subr.bf16.mxu0 %v1474_v31  ;;  %940 = vmatprep.subr.bf16.mxu1 %v1482_v37  ;;  %p295_p8 = scmp.lt.s32.totalorder %s1272_s25, 7 }
  0x4d   : > { %p1567_p2 = pneg %p1566_p0 }
  0x4e   : > { %941 = vmatpush1.bf16.msra.mxu1 %v1487_v41  ;;  %s2070_s25 = smov (!%p295_p8, %s1272_s25), 7 }
  0x4f   : > { %1010 = vmatpush1.bf16.msra.mxu0 %v1472_v34  ;;  %942 = vmatprep.subr.bf16.mxu1 %v1488_v42  ;;  %s297_s13 = scalar_lea.vmem %s2054_s4, %s2070_s25  ;;  %s1570_s25 = scalar_lea.vmem %s1569_s28, 8192 }
  0x50   : > { %1011 = vmatprep.subr.bf16.mxu0 %v1480_v35  ;;  %p1572_p5 = scmp.lt.s32.totalorder %s1570_s25, %s1564_s30 }
  0x52   : > { %1286 = vmatmul.mubr.msk.bf16.gmra.mxu0 %vm378_vm0, %v1439_v38  ;;  %943 = vmatpush2.bf16.msra.mxu1 %v1493_v45  ;;  %p1573_p6 = por %p1572_p5, %p1571_p3 }
  0x53   : > { %1012 = vmatpush1.bf16.msra.mxu0 %v1478_v39  ;;  %944 = vmatprep.subr.bf16.mxu1 %v1494_v47 }
  0x54   : > { %1013 = vmatprep.subr.bf16.mxu0 %v1486_v40  ;;  %p1574_p7 = pnand %p1573_p6, %p1567_p2 }
  0x56   : > { %945 = vmatpush2.bf16.msra.mxu1 %v1499_v49 }
  0x57   : > { %1014 = vmatpush1.bf16.msra.mxu0 %v1484_v43  ;;  %946 = vmatprep.subr.bf16.mxu1 %v1500_v50 }
  0x58   : > { %1015 = vmatprep.subr.bf16.mxu0 %v1492_v44 }
  0x5a   : > { %947 = vmatpush2.bf16.msra.mxu1 %v1505_v53 }
  0x5b   : > { %1016 = vmatpush2.bf16.msra.mxu0 %v1490_v46  ;;  %948 = vmatprep.subr.bf16.mxu1 %v1506_v54 }
  0x5c   : > { %1017 = vmatprep.subr.bf16.mxu0 %v1498_v48 }
  0x5e   : > { %949 = vmatpush2.bf16.msra.mxu1 %v1511_v57 }
  0x5f   : > { %1018 = vmatpush2.bf16.msra.mxu0 %v1496_v51  ;;  %950 = vmatprep.subr.bf16.mxu1 %v1512_v58 }
  0x60   : > { %1019 = vmatprep.subr.bf16.mxu0 %v1504_v52 }
  0x62   : > { %951 = vmatpush2.bf16.msra.mxu1 %v1517_v62 }
  0x63   : > { %1020 = vmatpush2.bf16.msra.mxu0 %v1502_v55  ;;  %952 = vmatprep.subr.bf16.mxu1 %v1518_v63 }
  0x64   : > { %1021 = vmatprep.subr.bf16.mxu0 %v1510_v56 }
  0x66   : > { %953 = vmatpush2.bf16.msra.mxu1 %v1523_v2 }
  0x67   : > { %1022 = vmatpush2.bf16.msra.mxu0 %v1508_v59  ;;  %954 = vmatprep.subr.bf16.mxu1 %v1524_v3 }
  0x68   : > { %1023 = vmatprep.subr.bf16.mxu0 %v1516_v60 }
  0x6a   : > { %955 = vmatpush2.bf16.msra.mxu1 %v1529_v6 }
  0x6b   : > { %1024 = vmatpush2.bf16.msra.mxu0 %v1514_v61  ;;  %956 = vmatprep.subr.bf16.mxu1 %v1530_v7 }
  0x6c   : > { %1025 = vmatprep.subr.bf16.mxu0 %v1522_v0 }
  0x6e   : > { %957 = vmatpush2.bf16.msra.mxu1 %v1535_v10 }
  0x6f   : > { %1026 = vmatpush2.bf16.msra.mxu0 %v1520_v1 }
  0x70   : > { %1027 = vmatprep.subr.bf16.mxu0 %v1528_v4 }
  0x73   : > { %1028 = vmatpush2.bf16.msra.mxu0 %v1526_v5 }
  0x74   : > { %1029 = vmatprep.subr.bf16.mxu0 %v1534_v8 }
  0x77   : > { %1030 = vmatpush2.bf16.msra.mxu0 %v1532_v9 }
  0xfa   : > { %v425_v18 = vpop.f32.mrf.mxu0 }
  0xfb   : > { %v426_v21 = vadd.f32 %v425_v18, %v1892_v17 }
  0xfc   : > { %v427_v19 = vpop.f32.mrf.mxu0 }
  0xfd   : > { %v428_v20 = vadd.f32 %v427_v19, %v1888_v16  ;;  %v480_v28 = vmul.f32 0.2, %v426_v21  ;;  %vm464_vm3 = vcmp.gt.f32.partialorder %v426_v21, 0.0 }
  0xfe   : > { %v429_v22 = vpop.f32.mrf.mxu0 }
  0xff   : > { %v430_v23 = vadd.f32 %v429_v22, %v1892_v17  ;;  %v481_v25 = vmul.f32 0.2, %v428_v20  ;;  %vm465_vm2 = vcmp.gt.f32.partialorder %v428_v20, 0.0  ;;  %v496_v39 = vsel %vm464_vm3, %v426_v21, %v480_v28 }
 0x100   : > { %v431_v24 = vpop.f32.mrf.mxu0 }
 0x101   : > { %vm466_vm1 = vcmp.gt.f32.partialorder %v430_v23, 0.0  ;;  %v482_v26 = vmul.f32 0.2, %v430_v23  ;;  %v432_v27 = vadd.f32 %v431_v24, %v1888_v16  ;;  %v497_v34 = vsel %vm465_vm2, %v428_v20, %v481_v25 }
 0x102   : > { %v435_v29 = vpop.f32.mrf.mxu0 }
 0x103   : > { %v483_v30 = vmul.f32 0.2, %v432_v27  ;;  %vm467_vm4 = vcmp.gt.f32.partialorder %v432_v27, 0.0  ;;  %v498_v32 = vsel %vm466_vm1, %v430_v23, %v482_v26  ;;  %v436_v36 = vadd.f32 %v435_v29, %v1892_v17 }
 0x104   : > { %v437_v31 = vpop.f32.mrf.mxu0  ;;  %v512_v41 = vpack.c.bf16 %v498_v32, %v496_v39 }
 0x105   : > { %v438_v33 = vadd.f32 %v437_v31, %v1888_v16  ;;  %v499_v35 = vsel %vm467_vm4, %v432_v27, %v483_v30  ;;  %v484_v46 = vmul.f32 0.2, %v436_v36  ;;  %vm468_vm7 = vcmp.gt.f32.partialorder %v436_v36, 0.0  ;;  %v584_v30 = vld [vmem:[%s297_s13] sm:$0xf] }
 0x106   : > { %v439_v37 = vpop.f32.mrf.mxu0  ;;  %v513_v38 = vpack.c.bf16 %v499_v35, %v497_v34  ;;  %v600_v31 = vsub.s32 3, %v1879_v12  ;;  %v1918_v32 = vrot.slane %v584_v30, %v320_v14  ;;  %v1925_v34 = vrot.slane %v584_v30, %v324_v13 }
 0x107   : > { %v440_v40 = vadd.f32 %v439_v37, %v1892_v17  ;;  %v485_v43 = vmul.f32 0.2, %v438_v33  ;;  %vm469_vm6 = vcmp.gt.f32.partialorder %v438_v33, 0.0  ;;  %v500_v57 = vsel %vm468_vm7, %v436_v36, %v484_v46 }
 0x108   : > { %v441_v42 = vpop.f32.mrf.mxu0  ;;  %958 = vmatprep.mubr.bf16.mxu1 %v513_v38  ;;  %1031 = vmatprep.mubr.bf16.mxu0 %v513_v38  ;;  %v1927_v35 = vrot.slane %v584_v30, %v600_v31 }
 0x109   : > { %vm470_vm5 = vcmp.gt.f32.partialorder %v440_v40, 0.0  ;;  %v486_v44 = vmul.f32 0.2, %v440_v40  ;;  %v442_v45 = vadd.f32 %v441_v42, %v1888_v16  ;;  %959 = vmatmul.mubr.bf16.vlgmr.msra.gmra.mxu1 %v512_v41  ;;  %1032 = vmatmul.mubr.bf16.vlgmr.msra.gmra.mxu0 %v512_v41  ;;  %v501_v52 = vsel %vm469_vm6, %v438_v33, %v485_v43 }
 0x10a   : > { %v445_v47 = vpop.f32.mrf.mxu0 }
 0x10b   : > { %vm471_vm8 = vcmp.gt.f32.partialorder %v442_v45, 0.0  ;;  %v487_v48 = vmul.f32 0.2, %v442_v45  ;;  %v502_v50 = vsel %vm470_vm5, %v440_v40, %v486_v44  ;;  %v446_v54 = vadd.f32 %v445_v47, %v1892_v17 }
 0x10c   : > { %v447_v49 = vpop.f32.mrf.mxu0  ;;  %v514_v59 = vpack.c.bf16 %v502_v50, %v500_v57 }
 0x10d   : > { %v448_v51 = vadd.f32 %v447_v49, %v1888_v16  ;;  %v503_v53 = vsel %vm471_vm8, %v442_v45, %v487_v48  ;;  %v488_v0 = vmul.f32 0.2, %v446_v54  ;;  %vm472_vm11 = vcmp.gt.f32.partialorder %v446_v54, 0.0 }
 0x10e   : > { %v449_v55 = vpop.f32.mrf.mxu0  ;;  %v515_v56 = vpack.c.bf16 %v503_v53, %v501_v52 }
 0x10f   : > { %v450_v58 = vadd.f32 %v449_v55, %v1892_v17  ;;  %v489_v61 = vmul.f32 0.2, %v448_v51  ;;  %vm473_vm10 = vcmp.gt.f32.partialorder %v448_v51, 0.0  ;;  %v504_v11 = vsel %vm472_vm11, %v446_v54, %v488_v0 }
 0x110   : > { %v451_v60 = vpop.f32.mrf.mxu0  ;;  %968 = vmatprep.mubr.bf16.mxu1 %v515_v56  ;;  %1041 = vmatprep.mubr.bf16.mxu0 %v515_v56 }
 0x111   : > { %vm474_vm9 = vcmp.gt.f32.partialorder %v450_v58, 0.0  ;;  %v490_v62 = vmul.f32 0.2, %v450_v58  ;;  %v452_v63 = vadd.f32 %v451_v60, %v1888_v16  ;;  %969 = vmatmul.mubr.bf16.gmra.mxu1 %v514_v59  ;;  %1042 = vmatmul.mubr.bf16.gmra.mxu0 %v514_v59  ;;  %v505_v6 = vsel %vm473_vm10, %v448_v51, %v489_v61 }
 0x112   : > { %v455_v1 = vpop.f32.mrf.mxu0 }
 0x113   : > { %vm475_vm12 = vcmp.gt.f32.partialorder %v452_v63, 0.0  ;;  %v491_v2 = vmul.f32 0.2, %v452_v63  ;;  %v506_v4 = vsel %vm474_vm9, %v450_v58, %v490_v62  ;;  %v456_v8 = vadd.f32 %v455_v1, %v1892_v17 }
 0x114   : > { %v457_v3 = vpop.f32.mrf.mxu0  ;;  %v516_v18 = vpack.c.bf16 %v506_v4, %v504_v11 }
 0x115   : > { %v458_v5 = vadd.f32 %v457_v3, %v1888_v16  ;;  %v507_v7 = vsel %vm475_vm12, %v452_v63, %v491_v2  ;;  %v492_v23 = vmul.f32 0.2, %v456_v8  ;;  %vm476_vm15 = vcmp.gt.f32.partialorder %v456_v8, 0.0 }
 0x116   : > { %v459_v9 = vpop.f32.mrf.mxu0  ;;  %v517_v10 = vpack.c.bf16 %v507_v7, %v505_v6 }
 0x117   : > { %v460_v15 = vadd.f32 %v459_v9, %v1892_v17  ;;  %v493_v20 = vmul.f32 0.2, %v458_v5  ;;  %vm477_vm14 = vcmp.gt.f32.partialorder %v458_v5, 0.0  ;;  %v508_v28 = vsel %vm476_vm15, %v456_v8, %v492_v23 }
 0x118   : > { %v461_v19 = vpop.f32.mrf.mxu0  ;;  %978 = vmatprep.mubr.bf16.mxu1 %v517_v10  ;;  %1051 = vmatprep.mubr.bf16.mxu0 %v517_v10 }
 0x119   : > { %vm478_vm13 = vcmp.gt.f32.partialorder %v460_v15, 0.0  ;;  %v494_v21 = vmul.f32 0.2, %v460_v15  ;;  %v462_v22 = vadd.f32 %v461_v19, %v1888_v16  ;;  %979 = vmatmul.mubr.bf16.gmra.mxu1 %v516_v18  ;;  %1052 = vmatmul.mubr.bf16.gmra.mxu0 %v516_v18  ;;  %v509_v26 = vsel %vm477_vm14, %v458_v5, %v493_v20 }
 0x11a   : > { %v596_v16 = vsub.s32 2, %v1879_v12 }
 0x11b   : > { %vm479_vm0 = vcmp.gt.f32.partialorder %v462_v22, 0.0  ;;  %v495_v24 = vmul.f32 0.2, %v462_v22  ;;  %v510_v25 = vsel %vm478_vm13, %v460_v15, %v494_v21 }
 0x11c   : > { %v518_v29 = vpack.c.bf16 %v510_v25, %v508_v28  ;;  %v1920_v33 = vrot.slane %v584_v30, %v596_v16 }
 0x11d   : > { %v511_v17 = vsel %vm479_vm0, %v462_v22, %v495_v24 }
 0x11e   : > { %v519_v27 = vpack.c.bf16 %v511_v17, %v509_v26 }
 0x120   : > { %988 = vmatprep.mubr.bf16.mxu1 %v519_v27  ;;  %1061 = vmatprep.mubr.bf16.mxu0 %v519_v27 }
 0x121   : > { %989 = vmatmul.mubr.bf16.gmra.mxu1 %v518_v29  ;;  %1062 = vmatmul.mubr.bf16.gmra.mxu0 %v518_v29 }
 0x1c9   : > { %v960_v36 = vpop.f32.mrf.mxu1  ;;  %v1033_v37 = vpop.f32.mrf.mxu0 }
 0x1ca   : > { %v961_v38 = vadd.f32 %v960_v36, %v1918_v32  ;;  %v1034_v39 = vadd.f32 %v1033_v37, %v1920_v33 }
 0x1cb   : > { %v962_v40 = vpop.f32.mrf.mxu1  ;;  %v1035_v41 = vpop.f32.mrf.mxu0 }
 0x1cc   : > { %v1072_v42 = vmax.f32 %v961_v38, 0.0  ;;  %v1074_v14 = vmax.f32 %v1034_v39, 0.0  ;;  %v963_v43 = vadd.f32 %v962_v40, %v1925_v34  ;;  %v1036_v44 = vadd.f32 %v1035_v41, %v1927_v35 }
 0x1cd   : > { %v964_v45 = vpop.f32.mrf.mxu1  ;;  %v1037_v12 = vpop.f32.mrf.mxu0 }
 0x1ce   : > { %1104 = vst [vmem:[%s1933_s14] sm:$0xff] %v1072_v42  ;;  %1106 = vst [vmem:[%s1933_s14 + $0x10] sm:$0xff] %v1074_v14  ;;  %v1073_v13 = vmax.f32 %v963_v43, 0.0  ;;  %v1075_v46 = vmax.f32 %v1036_v44, 0.0  ;;  %v965_v47 = vadd.f32 %v964_v45, %v1918_v32  ;;  %v1038_v48 = vadd.f32 %v1037_v12, %v1920_v33 }
 0x1cf   : > { %v966_v49 = vpop.f32.mrf.mxu1  ;;  %v1039_v50 = vpop.f32.mrf.mxu0 }
 0x1d0   : > { %1105 = vst [vmem:[%s1933_s14 + $0x8] sm:$0xff] %v1073_v13  ;;  %1107 = vst [vmem:[%s1933_s14 + $0x18] sm:$0xff] %v1075_v46  ;;  %v1076_v51 = vmax.f32 %v965_v47, 0.0  ;;  %v1078_v52 = vmax.f32 %v1038_v48, 0.0  ;;  %v967_v53 = vadd.f32 %v966_v49, %v1925_v34  ;;  %v1040_v54 = vadd.f32 %v1039_v50, %v1927_v35 }
 0x1d1   : > { %v970_v55 = vpop.f32.mrf.mxu1  ;;  %v1043_v56 = vpop.f32.mrf.mxu0 }
 0x1d2   : > { %1108 = vst [vmem:[%s1933_s14 + $0x20] sm:$0xff] %v1076_v51  ;;  %1110 = vst [vmem:[%s1933_s14 + $0x30] sm:$0xff] %v1078_v52  ;;  %v1077_v57 = vmax.f32 %v967_v53, 0.0  ;;  %v1079_v58 = vmax.f32 %v1040_v54, 0.0  ;;  %v971_v59 = vadd.f32 %v970_v55, %v1918_v32  ;;  %v1044_v60 = vadd.f32 %v1043_v56, %v1920_v33 }
 0x1d3   : > { %v972_v61 = vpop.f32.mrf.mxu1  ;;  %v1045_v62 = vpop.f32.mrf.mxu0 }
 0x1d4   : > { %1109 = vst [vmem:[%s1933_s14 + $0x28] sm:$0xff] %v1077_v57  ;;  %1111 = vst [vmem:[%s1933_s14 + $0x38] sm:$0xff] %v1079_v58  ;;  %v1080_v63 = vmax.f32 %v971_v59, 0.0  ;;  %v1082_v0 = vmax.f32 %v1044_v60, 0.0  ;;  %v973_v1 = vadd.f32 %v972_v61, %v1925_v34  ;;  %v1046_v2 = vadd.f32 %v1045_v62, %v1927_v35 }
 0x1d5   : > { %v974_v3 = vpop.f32.mrf.mxu1  ;;  %v1047_v4 = vpop.f32.mrf.mxu0 }
 0x1d6   : > { %1112 = vst [vmem:[%s1933_s14 + $0x40] sm:$0xff] %v1080_v63  ;;  %1114 = vst [vmem:[%s1933_s14 + $0x50] sm:$0xff] %v1082_v0  ;;  %v1081_v5 = vmax.f32 %v973_v1, 0.0  ;;  %v1083_v6 = vmax.f32 %v1046_v2, 0.0  ;;  %v975_v7 = vadd.f32 %v974_v3, %v1918_v32  ;;  %v1048_v8 = vadd.f32 %v1047_v4, %v1920_v33 }
 0x1d7   : > { %v976_v9 = vpop.f32.mrf.mxu1  ;;  %v1049_v10 = vpop.f32.mrf.mxu0 }
 0x1d8   : > { %1113 = vst [vmem:[%s1933_s14 + $0x48] sm:$0xff] %v1081_v5  ;;  %1115 = vst [vmem:[%s1933_s14 + $0x58] sm:$0xff] %v1083_v6  ;;  %v1084_v11 = vmax.f32 %v975_v7, 0.0  ;;  %v1086_v15 = vmax.f32 %v1048_v8, 0.0  ;;  %v977_v18 = vadd.f32 %v976_v9, %v1925_v34  ;;  %v1050_v19 = vadd.f32 %v1049_v10, %v1927_v35 }
 0x1d9   : > { %v980_v20 = vpop.f32.mrf.mxu1  ;;  %v1053_v21 = vpop.f32.mrf.mxu0 }
 0x1da   : > { %1116 = vst [vmem:[%s1933_s14 + $0x60] sm:$0xff] %v1084_v11  ;;  %1118 = vst [vmem:[%s1933_s14 + $0x70] sm:$0xff] %v1086_v15  ;;  %v1085_v22 = vmax.f32 %v977_v18, 0.0  ;;  %v1087_v23 = vmax.f32 %v1050_v19, 0.0  ;;  %v981_v24 = vadd.f32 %v980_v20, %v1918_v32  ;;  %v1054_v25 = vadd.f32 %v1053_v21, %v1920_v33 }
 0x1db   : > { %v982_v26 = vpop.f32.mrf.mxu1  ;;  %v1055_v17 = vpop.f32.mrf.mxu0 }
 0x1dc   : > { %1117 = vst [vmem:[%s1933_s14 + $0x68] sm:$0xff] %v1085_v22  ;;  %1119 = vst [vmem:[%s1933_s14 + $0x78] sm:$0xff] %v1087_v23  ;;  %v1088_v27 = vmax.f32 %v981_v24, 0.0  ;;  %v1090_v28 = vmax.f32 %v1054_v25, 0.0  ;;  %v983_v29 = vadd.f32 %v982_v26, %v1925_v34  ;;  %v1056_v16 = vadd.f32 %v1055_v17, %v1927_v35 }
 0x1dd   : > { %v984_v30 = vpop.f32.mrf.mxu1  ;;  %v1057_v31 = vpop.f32.mrf.mxu0 }
 0x1de   : > { %1120 = vst [vmem:[%s1933_s14 + $0x80] sm:$0xff] %v1088_v27  ;;  %1122 = vst [vmem:[%s1933_s14 + $0x90] sm:$0xff] %v1090_v28  ;;  %v1089_v36 = vmax.f32 %v983_v29, 0.0  ;;  %v1091_v37 = vmax.f32 %v1056_v16, 0.0  ;;  %v985_v38 = vadd.f32 %v984_v30, %v1918_v32  ;;  %v1058_v39 = vadd.f32 %v1057_v31, %v1920_v33 }
 0x1df   : > { %v986_v40 = vpop.f32.mrf.mxu1  ;;  %v1059_v41 = vpop.f32.mrf.mxu0 }
 0x1e0   : > { %1121 = vst [vmem:[%s1933_s14 + $0x88] sm:$0xff] %v1089_v36  ;;  %1123 = vst [vmem:[%s1933_s14 + $0x98] sm:$0xff] %v1091_v37  ;;  %v1092_v42 = vmax.f32 %v985_v38, 0.0  ;;  %v1094_v14 = vmax.f32 %v1058_v39, 0.0  ;;  %v987_v43 = vadd.f32 %v986_v40, %v1925_v34  ;;  %v1060_v44 = vadd.f32 %v1059_v41, %v1927_v35 }
 0x1e1   : > { %v990_v45 = vpop.f32.mrf.mxu1  ;;  %v1063_v12 = vpop.f32.mrf.mxu0 }
 0x1e2   : > { %1124 = vst [vmem:[%s1933_s14 + $0xa0] sm:$0xff] %v1092_v42  ;;  %1126 = vst [vmem:[%s1933_s14 + $0xb0] sm:$0xff] %v1094_v14  ;;  %v1093_v13 = vmax.f32 %v987_v43, 0.0  ;;  %v1095_v46 = vmax.f32 %v1060_v44, 0.0  ;;  %v991_v47 = vadd.f32 %v990_v45, %v1918_v32  ;;  %v1064_v48 = vadd.f32 %v1063_v12, %v1920_v33 }
 0x1e3   : > { %v992_v49 = vpop.f32.mrf.mxu1  ;;  %v1065_v50 = vpop.f32.mrf.mxu0 }
 0x1e4   : > { %1125 = vst [vmem:[%s1933_s14 + $0xa8] sm:$0xff] %v1093_v13  ;;  %1127 = vst [vmem:[%s1933_s14 + $0xb8] sm:$0xff] %v1095_v46  ;;  %v1096_v51 = vmax.f32 %v991_v47, 0.0  ;;  %v1098_v52 = vmax.f32 %v1064_v48, 0.0  ;;  %v993_v53 = vadd.f32 %v992_v49, %v1925_v34  ;;  %v1066_v54 = vadd.f32 %v1065_v50, %v1927_v35 }
 0x1e5   : > { %v994_v55 = vpop.f32.mrf.mxu1  ;;  %v1067_v56 = vpop.f32.mrf.mxu0 }
 0x1e6   : > { %1128 = vst [vmem:[%s1933_s14 + $0xc0] sm:$0xff] %v1096_v51  ;;  %1130 = vst [vmem:[%s1933_s14 + $0xd0] sm:$0xff] %v1098_v52  ;;  %v1097_v57 = vmax.f32 %v993_v53, 0.0  ;;  %v1099_v58 = vmax.f32 %v1066_v54, 0.0  ;;  %v995_v59 = vadd.f32 %v994_v55, %v1918_v32  ;;  %v1068_v60 = vadd.f32 %v1067_v56, %v1920_v33 }
 0x1e7   : > { %v996_v61 = vpop.f32.mrf.mxu1  ;;  %v1069_v62 = vpop.f32.mrf.mxu0 }
 0x1e8   : > { %1129 = vst [vmem:[%s1933_s14 + $0xc8] sm:$0xff] %v1097_v57  ;;  %1131 = vst [vmem:[%s1933_s14 + $0xd8] sm:$0xff] %v1099_v58  ;;  %v1100_v63 = vmax.f32 %v995_v59, 0.0  ;;  %v1102_v0 = vmax.f32 %v1068_v60, 0.0  ;;  %v997_v1 = vadd.f32 %v996_v61, %v1925_v34  ;;  %v1070_v2 = vadd.f32 %v1069_v62, %v1927_v35 }
 0x1ea   : > { %1132 = vst [vmem:[%s1933_s14 + $0xe0] sm:$0xff] %v1100_v63  ;;  %1134 = vst [vmem:[%s1933_s14 + $0xf0] sm:$0xff] %v1102_v0  ;;  %v1101_v32 = vmax.f32 %v997_v1, 0.0  ;;  %v1103_v33 = vmax.f32 %v1070_v2, 0.0 }
 0x1ec   : > { %1133 = vst [vmem:[%s1933_s14 + $0xe8] sm:$0xff] %v1101_v32  ;;  %1135 = vst [vmem:[%s1933_s14 + $0xf8] sm:$0xff] %v1103_v33 }
 0x1ed   : > { %1577 = shalt.err (!%p1574_p7)
}
 0x1ee   : > { %s1578_s9 = scalar_lea.hbm %s1996_s27, 4096  ;;  %s1582_s15 = scalar_lea.hbm %s2055_s5, 8192 }
 0x1ef   : > { %p1579_p10 = scmp.ne.s32.totalorder %s1996_s27, %s1578_s9  ;;  %p1583_p1 = scmp.lt.s32.totalorder %s1996_s27, %s2055_s5 }
 0x1f0   : > { %p1584_p8 = scmp.lt.s32.totalorder %s1582_s15, %s1578_s9 }
 0x1f1   : > { %p1580_p4 = pnand %p1579_p10, %p1736_p9 }
 0x1f2   : > { %p1585_p12 = por %p1584_p8, %p1583_p1 }
 0x1f3   : > { %p1581_p13 = pneg %p1580_p4 }
 0x1f5   : > { %p1586_p0 = pnand %p1585_p12, %p1581_p13 }
 0x1f7   : > { %1589 = shalt.err (!%p1586_p0)
}
 0x1f8   : > { %s1652_s21 = smov 512   ;;  %s1653_s24 = smov 1024  }
 0x1f9   : > { %s1654_s30 = smov 32  }
 0x1fa   : > { %1360 = dma.vmem_to_hbm [thread:$0]  (%p1736_p9), %s1998_s17, 4096, %s1996_s27, %s1137_s29, %s1652_s21, %s1653_s24, %s1654_s30  }
 0x1fb PF: > { %s1168_s11 = sand.u32 1, %s1624_s18   ;;  %p2061_p2 = scmp.ge.s32.totalorder %s1644_s23, 2 }
 0x1fc   : > { %s1169_s28 = scalar_lea.sflag [#allocation4], %s1168_s11 }
 0x1fd   : > { %p1367_p3 = pnand %p2061_p2, %p1743_p11 }
 0x1ff   : > { %p1368_p5 = pneg %p1367_p3 }
 0x201   : > { %1619 = dma.done.wait (%p1368_p5), %s1169_s28, 4096  }
 0x202   : > { %1621 = vsyncadd (%p1368_p5), %s1169_s28, 4294963200  ;;  %s21_s23 = sadd.s32 1, %s1644_s23   ;;  %s2062_s18 = smov %s1628_s19 }
 0x203   : > { %p18_p6 = scmp.ge.s32.totalorder %s21_s23, 4   ;;  %s2063_s19 = smov %s1632_s20 }
 0x204   : > { %s2064_s20 = smov %s1741_s7  ;;  %s2065_s21 = smov %s1640_s22 }
 0x205   : > { %s2066_s22 = smov %s2068_s26  ;;  %20 = sbr.rel (!%p18_p6) target bundleno = 6 (0x6), region = 91 }
 0x20a   :  { %1174 = vsyncpa [#allocation3], 1 }
 0x20b   :  { %1176 = vsyncpa [#allocation3 + $0x1], 1 }
 0x20c   :  { %1177 = vsyncpa [#allocation4], 1 }
 0x20d   :  { %1179 = vsyncpa [#allocation4 + $0x1], 1 }

</bundles_post_ra>
